<compile_context>
chip_gen: v5e
topology: v5e:2x2
jax: 0.10.0
libtpu: 0.0.40
codegen_flags: <defaults>
</compile_context>

<pallas_src>
import functools

import jax
import jax.numpy as jnp
from jax import lax
from jax.experimental import pallas as pl
from jax.experimental.pallas import tpu as pltpu

_LANE = 128
_NEG_INF = -1e30


def _round_up(v, m):
    return (v + m - 1) // m * m


def _lstm_head_kernel(x_ref, w_ih_ref, w_hh_ref, b_ref, w_lab_ref, b_lab_ref,
                      out_ref, xw_ref, *, seq_len, hidden_pad, unroll,
                      compute_dtype):
    """Whole forward for one block of the non-recurrent (N) axis.

    x_ref    : (S, bn, D)     full sequence, resident in VMEM (f32)
    w_ih_ref : (D, 4Hp)       input->gates, columns [i|f|o|g], compute dtype
    w_hh_ref : (Hp, 4Hp)      hidden->gates, same column order, compute dtype
    b_ref    : (1, 4Hp)       b_ih + b_hh   (padded lanes 0), f32
    w_lab_ref: (Hp, Op)       classifier weights (zero padded), f32
    b_lab_ref: (1, Op)        classifier bias (padded classes = -1e30), f32
    out_ref  : (bn, Op)       log-probabilities (padded classes sliced outside)
    xw_ref   : (S*bn, 4Hp)    VMEM scratch: precomputed x@W_ih + b, f32
    """
    Hp = hidden_pad
    n = x_ref.shape[1]
    d = x_ref.shape[2]

    # ---- Off-chain precompute: input projection for ALL timesteps as ONE
    # matmul (not S tiny ones on the serial chain), bias folded in here.
    x_all = x_ref[...].reshape(seq_len * n, d).astype(compute_dtype)
    xw_ref[...] = (jnp.dot(x_all, w_ih_ref[...],
                           preferred_element_type=jnp.float32)
                   + b_ref[...])

    def step(t, carry):
        h, c = carry
        start = t * n
        if n % 8 == 0:
            start = pl.multiple_of(start, 8)
        # Stream w_hh from VMEM every iteration (do NOT hold it in vregs).
        gates = (xw_ref[pl.ds(start, n), :]
                 + jnp.dot(h.astype(compute_dtype), w_hh_ref[...],
                           preferred_element_type=jnp.float32))   # (bn,4Hp) f32
        # Column layout [i | f | o | g]: sigmoid of the contiguous (bn, 3Hp)
        # slab via the tanh identity (single EUP pass), tanh of (bn, Hp).
        sig = 0.5 * jnp.tanh(0.5 * gates[:, :3 * Hp]) + 0.5
        g = jnp.tanh(gates[:, 3 * Hp:])
        i = sig[:, :Hp]
        f = sig[:, Hp:2 * Hp]
        o = sig[:, 2 * Hp:3 * Hp]
        c_new = f * c + i * g
        h_new = o * jnp.tanh(c_new)
        return h_new, c_new

    h0 = jnp.zeros((n, Hp), jnp.float32)
    c0 = jnp.zeros((n, Hp), jnp.float32)
    h_last, _ = lax.fori_loop(0, seq_len, step, (h0, c0), unroll=unroll)

    # hidden2label on the last LSTM output, then log_softmax over classes
    # (runs once; kept in f32).
    y = (jnp.dot(h_last, w_lab_ref[...], preferred_element_type=jnp.float32)
         + b_lab_ref[...])                                        # (bn, Op)
    m = jnp.max(y, axis=-1, keepdims=True)
    z = y - m
    lse = jnp.log(jnp.sum(jnp.exp(z), axis=-1, keepdims=True))
    out_ref[...] = z - lse


def _prep_params(params, compute_dtype):
    """Reorder gates to [i|f|o|g], lane-pad H->Hp and O->Op, fold biases."""
    w_ih, w_hh, b_ih, b_hh, w_lab, b_lab = params
    H = w_hh.shape[1]
    O = w_lab.shape[0]
    Hp = _round_up(H, _LANE)
    Op = _round_up(O, _LANE)

    def pad_cols(a, target):
        return jnp.pad(a, ((0, 0), (0, target - a.shape[1])))

    # PyTorch row order is (i, f, g, o); emit columns in (i, f, o, g) order so
    # the sigmoid gates form one contiguous slab, each zero-padded to Hp lanes.
    def gate_cols(w):                       # w: (4H, X) -> (X, 4Hp)
        i, f, g, o = (w[k * H:(k + 1) * H] for k in range(4))
        return jnp.concatenate(
            [pad_cols(jnp.transpose(blk), Hp) for blk in (i, f, o, g)], axis=1)

    w_ih_t = gate_cols(w_ih)                                     # (D, 4Hp)
    w_hh_t = jnp.pad(gate_cols(w_hh), ((0, Hp - H), (0, 0)))     # (Hp, 4Hp)

    bsum = b_ih + b_hh
    bi, bf, bg, bo = (bsum[k * H:(k + 1) * H] for k in range(4))
    b = jnp.concatenate(
        [jnp.pad(blk, (0, Hp - H)) for blk in (bi, bf, bo, bg)]).reshape(1, 4 * Hp)

    w_lab_t = jnp.pad(jnp.transpose(w_lab),
                      ((0, Hp - H), (0, Op - O)))                # (Hp, Op)
    # Padded class columns get a huge negative bias so exp() underflows to 0
    # in the in-kernel log_softmax; the wrapper slices them away.
    b_lab_p = jnp.concatenate(
        [b_lab, jnp.full((Op - O,), _NEG_INF, b_lab.dtype)]).reshape(1, Op)

    return (w_ih_t.astype(compute_dtype), w_hh_t.astype(compute_dtype),
            b.astype(jnp.float32), w_lab_t.astype(jnp.float32),
            b_lab_p.astype(jnp.float32), Hp, Op)


def sequential_mnist_forward(x, params, *, use_bf16_matmul=True):
    """x: (T, 1, B, D) float32. Returns log_probs of shape (T, out_size).

    use_bf16_matmul (default True): feed bf16 operands to the MXU (weights,
    xs, h) with f32 accumulation.  All elementwise / transcendental math stays
    f32, so this is safe on v5e as well as v6e/v7x (no bf16 ever reaches the
    VPU/EUP).  Set False only when exact f32 parity with the reference is
    required.
    """
    w_ih, w_hh, b_ih, b_hh, w_lab, b_lab = params
    # Same permute/select as the PyTorch module: (T,1,B,D) -> (B,T,D), fed to
    # nn.LSTM without batch_first => recurrence over original B, "batch" = T.
    xs = jnp.transpose(x, (1, 2, 0, 3))[0].astype(jnp.float32)   # (S, N, D)
    S, N, D = xs.shape
    O = w_lab.shape[0]

    compute_dtype = jnp.bfloat16 if use_bf16_matmul else jnp.float32
    (w_ih_t, w_hh_t, b, w_lab_t, b_lab_p, Hp, Op) = _prep_params(
        params, compute_dtype)

    # Single grid step: the whole sequence block is VMEM-resident and the
    # recurrence is an in-kernel loop (no per-time-step grid/DMA overhead).
    # Megacore note: the h->h chain is serial, so splitting the N axis across
    # TCs does NOT shorten latency; only split (n_block = multiple of 8,
    # grid > 1, "parallel") when N is large AND the kernel is
    # VPU/EUP/MXU-throughput bound at large bn.
    n_block = N
    grid = (pl.cdiv(N, n_block),)
    unroll = True if S <= 16 else 4

    kernel = functools.partial(_lstm_head_kernel, seq_len=S, hidden_pad=Hp,
                               unroll=unroll, compute_dtype=compute_dtype)

    def _nbytes(a):
        return int(a.size) * a.dtype.itemsize

    # Double-buffered pipelined operands x2, plus the single-buffer xw scratch
    # and headroom.  (At larger H, additionally single-buffer the constant
    # weight specs with pipeline_mode=pl.Buffered(1) to stay under v7x's
    # 64 MiB VMEM.)
    vmem_est = (2 * (_nbytes(xs) + _nbytes(w_ih_t) + _nbytes(w_hh_t)
                     + _nbytes(b) + _nbytes(w_lab_t) + _nbytes(b_lab_p)
                     + N * Op * 4)
                + S * n_block * 4 * Hp * 4)
    vmem_limit = int(min(max(vmem_est + (4 << 20), 16 << 20), 60 << 20))

    out = pl.pallas_call(
        kernel,
        out_shape=jax.ShapeDtypeStruct((N, Op), jnp.float32),
        grid_spec=pltpu.PrefetchScalarGridSpec(
            num_scalar_prefetch=0,
            grid=grid,
            in_specs=[
                pl.BlockSpec((S, n_block, D), lambda n: (0, n, 0)),  # xs block
                pl.BlockSpec(w_ih_t.shape, lambda n: (0, 0)),        # (D, 4Hp)
                pl.BlockSpec(w_hh_t.shape, lambda n: (0, 0)),        # (Hp, 4Hp)
                pl.BlockSpec(b.shape, lambda n: (0, 0)),             # (1, 4Hp)
                pl.BlockSpec(w_lab_t.shape, lambda n: (0, 0)),       # (Hp, Op)
                pl.BlockSpec(b_lab_p.shape, lambda n: (0, 0)),       # (1, Op)
            ],
            out_specs=pl.BlockSpec((n_block, Op), lambda n: (n, 0)),
            scratch_shapes=[pltpu.VMEM((S * n_block, 4 * Hp), jnp.float32)],
        ),
        compiler_params=pltpu.CompilerParams(
            dimension_semantics=("parallel",),
            vmem_limit_bytes=vmem_limit,
        ),
    )(xs, w_ih_t, w_hh_t, b, w_lab_t, b_lab_p)

    return out[:, :O]


def _reference_forward(x, params):
    """Pure-JAX reference (matches PyTorch nn.LSTM + Linear + log_softmax)."""
    w_ih, w_hh, b_ih, b_hh, w_lab, b_lab = params
    xs = jnp.transpose(x, (1, 2, 0, 3))[0]           # (S, N, D)
    S, N, D = xs.shape
    H = w_hh.shape[1]

    def step(carry, x_t):
        h, c = carry
        gates = x_t @ w_ih.T + h @ w_hh.T + b_ih + b_hh
        i = jax.nn.sigmoid(gates[:, 0:H])
        f = jax.nn.sigmoid(gates[:, H:2 * H])
        g = jnp.tanh(gates[:, 2 * H:3 * H])
        o = jax.nn.sigmoid(gates[:, 3 * H:4 * H])
        c = f * c + i * g
        h = o * jnp.tanh(c)
        return (h, c), h

    init = (jnp.zeros((N, H), jnp.float32), jnp.zeros((N, H), jnp.float32))
    (h_last, _), _ = jax.lax.scan(step, init, xs)
    y = h_last @ w_lab.T + b_lab
    return jax.nn.log_softmax(y, axis=1)


def init_params(key, in_size, hidden_size, out_size):
    """Deterministic uniform(-1/sqrt(H), 1/sqrt(H)) init, PyTorch-style shapes."""
    k = jax.random.split(key, 6)
    s = 1.0 / jnp.sqrt(hidden_size)
    w_ih = jax.random.uniform(k[0], (4 * hidden_size, in_size), jnp.float32, -s, s)
    w_hh = jax.random.uniform(k[1], (4 * hidden_size, hidden_size), jnp.float32, -s, s)
    b_ih = jax.random.uniform(k[2], (4 * hidden_size,), jnp.float32, -s, s)
    b_hh = jax.random.uniform(k[3], (4 * hidden_size,), jnp.float32, -s, s)
    w_lab = jax.random.uniform(k[4], (out_size, hidden_size), jnp.float32, -s, s)
    b_lab = jax.random.uniform(k[5], (out_size,), jnp.float32, -s, s)
    return (w_ih, w_hh, b_ih, b_hh, w_lab, b_lab)


if __name__ == "__main__":
    # Small shapes consistent with the module: x is [time_step, 1, batch, in_size].
    T, B, D, H, O = 8, 4, 28, 32, 10
    key = jax.random.PRNGKey(0)
    kx, kp = jax.random.split(key)
    x = jax.random.normal(kx, (T, 1, B, D), jnp.float32)
    params = init_params(kp, D, H, O)

    # TODO(synk): lesion/blocked hidden-unit masking is a no-op for the default
    # constructor args (lesion=None, blocked=None) and is not implemented here.

    ref = jax.block_until_ready(_reference_forward(x, params))

    # f32-exact path (bit-accuracy check).
    out_f32 = jax.block_until_ready(
        sequential_mnist_forward(x, params, use_bf16_matmul=False))
    assert out_f32.shape == (T, O)
    err_f32 = float(jnp.max(jnp.abs(out_f32 - ref)))
    assert err_f32 < 1e-3, f"f32 path max abs error {err_f32}"

    # Default bf16-MXU path (f32 accumulate / f32 elementwise).
    out_bf16 = jax.block_until_ready(sequential_mnist_forward(x, params))
    assert out_bf16.shape == (T, O)
    err_bf16 = float(jnp.max(jnp.abs(out_bf16 - ref)))
    assert err_bf16 < 5e-2, f"bf16 path max abs error {err_bf16}"

    print("KERNEL_OK")
</pallas_src>

<mosaic_0001>
module attributes {stable_mosaic.version = 11 : i64} {
  func.func @_lstm_head_kernel(%arg0: i32, %arg1: memref<4x8x28xf32, #tpu.memory_space<vmem>>, %arg2: memref<28x512xf32, #tpu.memory_space<vmem>>, %arg3: memref<128x512xf32, #tpu.memory_space<vmem>>, %arg4: memref<1x512xf32, #tpu.memory_space<vmem>>, %arg5: memref<128x128xf32, #tpu.memory_space<vmem>>, %arg6: memref<1x128xf32, #tpu.memory_space<vmem>>, %arg7: memref<8x128xf32, #tpu.memory_space<vmem>>, %arg8: memref<32x512xf32, #tpu.memory_space<vmem>>) attributes {dimension_semantics = [#tpu.dimension_semantics<parallel>], iteration_bounds = array<i64: 1>, scalar_prefetch = 0 : i64, scratch_operands = 1 : i64, tpu.core_type = #tpu.core_type<tc>, window_params = [{transform_indices = @transform_0, window_bounds = array<i64: 4, 8, 28>}, {pipeline_mode = #tpu.pipeline_mode<synchronous>, transform_indices = @transform_1, window_bounds = array<i64: 28, 512>}, {pipeline_mode = #tpu.pipeline_mode<synchronous>, transform_indices = @transform_2, window_bounds = array<i64: 128, 512>}, {pipeline_mode = #tpu.pipeline_mode<synchronous>, transform_indices = @transform_3, window_bounds = array<i64: 1, 512>}, {pipeline_mode = #tpu.pipeline_mode<synchronous>, transform_indices = @transform_4, window_bounds = array<i64: 128, 128>}, {pipeline_mode = #tpu.pipeline_mode<synchronous>, transform_indices = @transform_5, window_bounds = array<i64: 1, 128>}, {transform_indices = @transform_6, window_bounds = array<i64: 8, 128>}]} {
    %c0 = arith.constant 0 : index
    %c0_0 = arith.constant 0 : index
    %c0_1 = arith.constant 0 : index
    %0 = vector.load %arg1[%c0, %c0_0, %c0_1] : memref<4x8x28xf32, #tpu.memory_space<vmem>>, vector<4x8x28xf32>
    %1 = vector.shape_cast %0 : vector<4x8x28xf32> to vector<32x28xf32>
    %c0_2 = arith.constant 0 : index
    %c0_3 = arith.constant 0 : index
    %2 = vector.load %arg2[%c0_2, %c0_3] : memref<28x512xf32, #tpu.memory_space<vmem>>, vector<28x512xf32>
    %cst = arith.constant dense<0.000000e+00> : vector<32x512xf32>
    %3 = tpu.matmul %1, %2, %cst {dimension_numbers = #tpu.dot_dimension_numbers<[1], [0], [0], [1], [0, 0, 1, 1], [], []>} : vector<32x28xf32>, vector<28x512xf32>, vector<32x512xf32> -> vector<32x512xf32>
    %c0_4 = arith.constant 0 : index
    %c0_5 = arith.constant 0 : index
    %4 = vector.load %arg4[%c0_4, %c0_5] : memref<1x512xf32, #tpu.memory_space<vmem>>, vector<1x512xf32>
    %5 = vector.broadcast %4 : vector<1x512xf32> to vector<32x512xf32>
    %6 = arith.addf %3, %5 : vector<32x512xf32>
    %c0_6 = arith.constant 0 : index
    %c0_7 = arith.constant 0 : index
    %7 = vector.load %arg8[%c0_6, %c0_7] : memref<32x512xf32, #tpu.memory_space<vmem>>, vector<32x512xf32>
    tpu.vector_store %arg8[%c0_6, %c0_7], %6 {strides = array<i32>} : memref<32x512xf32, #tpu.memory_space<vmem>>, vector<32x512xf32>,
    %cst_8 = arith.constant 0.000000e+00 : f32
    %8 = vector.broadcast %cst_8 : f32 to vector<8x128xf32>
    %cst_9 = arith.constant 0.000000e+00 : f32
    %9 = vector.broadcast %cst_9 : f32 to vector<8x128xf32>
    %c0_i32 = arith.constant 0 : i32
    %c8_i32 = arith.constant 8 : i32
    %10 = arith.muli %c0_i32, %c8_i32 : i32
    %11 = tpu.assume_multiple %10, 8 : i32
    %12 = arith.index_cast %11 : i32 to index
    %c0_10 = arith.constant 0 : index
    %13 = vector.load %arg8[%12, %c0_10] : memref<32x512xf32, #tpu.memory_space<vmem>>, vector<8x512xf32>
    %c0_11 = arith.constant 0 : index
    %c0_12 = arith.constant 0 : index
    %14 = vector.load %arg3[%c0_11, %c0_12] : memref<128x512xf32, #tpu.memory_space<vmem>>, vector<128x512xf32>
    %cst_13 = arith.constant dense<0.000000e+00> : vector<8x512xf32>
    %15 = tpu.matmul %8, %14, %cst_13 {dimension_numbers = #tpu.dot_dimension_numbers<[1], [0], [0], [1], [0, 0, 1, 1], [], []>} : vector<8x128xf32>, vector<128x512xf32>, vector<8x512xf32> -> vector<8x512xf32>
    %16 = arith.addf %13, %15 : vector<8x512xf32>
    %17 = vector.extract_strided_slice %16 {offsets = [0, 0], sizes = [8, 384], strides = [1, 1]} : vector<8x512xf32> to vector<8x384xf32>
    %cst_14 = arith.constant 5.000000e-01 : f32
    %18 = vector.broadcast %cst_14 : f32 to vector<8x384xf32>
    %19 = arith.mulf %18, %17 : vector<8x384xf32>
    %20 = math.tanh %19 : vector<8x384xf32>
    %cst_15 = arith.constant 5.000000e-01 : f32
    %21 = vector.broadcast %cst_15 : f32 to vector<8x384xf32>
    %22 = arith.mulf %21, %20 : vector<8x384xf32>
    %cst_16 = arith.constant 5.000000e-01 : f32
    %23 = vector.broadcast %cst_16 : f32 to vector<8x384xf32>
    %24 = arith.addf %22, %23 : vector<8x384xf32>
    %25 = vector.extract_strided_slice %16 {offsets = [0, 384], sizes = [8, 128], strides = [1, 1]} : vector<8x512xf32> to vector<8x128xf32>
    %26 = math.tanh %25 : vector<8x128xf32>
    %27 = vector.extract_strided_slice %24 {offsets = [0, 0], sizes = [8, 128], strides = [1, 1]} : vector<8x384xf32> to vector<8x128xf32>
    %28 = vector.extract_strided_slice %24 {offsets = [0, 128], sizes = [8, 128], strides = [1, 1]} : vector<8x384xf32> to vector<8x128xf32>
    %29 = vector.extract_strided_slice %24 {offsets = [0, 256], sizes = [8, 128], strides = [1, 1]} : vector<8x384xf32> to vector<8x128xf32>
    %30 = arith.mulf %28, %9 : vector<8x128xf32>
    %31 = arith.mulf %27, %26 : vector<8x128xf32>
    %32 = arith.addf %30, %31 : vector<8x128xf32>
    %33 = math.tanh %32 : vector<8x128xf32>
    %34 = arith.mulf %29, %33 : vector<8x128xf32>
    %c1_i32 = arith.constant 1 : i32
    %c8_i32_17 = arith.constant 8 : i32
    %35 = arith.muli %c1_i32, %c8_i32_17 : i32
    %36 = tpu.assume_multiple %35, 8 : i32
    %37 = arith.index_cast %36 : i32 to index
    %c0_18 = arith.constant 0 : index
    %38 = vector.load %arg8[%37, %c0_18] : memref<32x512xf32, #tpu.memory_space<vmem>>, vector<8x512xf32>
    %c0_19 = arith.constant 0 : index
    %c0_20 = arith.constant 0 : index
    %39 = vector.load %arg3[%c0_19, %c0_20] : memref<128x512xf32, #tpu.memory_space<vmem>>, vector<128x512xf32>
    %cst_21 = arith.constant dense<0.000000e+00> : vector<8x512xf32>
    %40 = tpu.matmul %34, %39, %cst_21 {dimension_numbers = #tpu.dot_dimension_numbers<[1], [0], [0], [1], [0, 0, 1, 1], [], []>} : vector<8x128xf32>, vector<128x512xf32>, vector<8x512xf32> -> vector<8x512xf32>
    %41 = arith.addf %38, %40 : vector<8x512xf32>
    %42 = vector.extract_strided_slice %41 {offsets = [0, 0], sizes = [8, 384], strides = [1, 1]} : vector<8x512xf32> to vector<8x384xf32>
    %cst_22 = arith.constant 5.000000e-01 : f32
    %43 = vector.broadcast %cst_22 : f32 to vector<8x384xf32>
    %44 = arith.mulf %43, %42 : vector<8x384xf32>
    %45 = math.tanh %44 : vector<8x384xf32>
    %cst_23 = arith.constant 5.000000e-01 : f32
    %46 = vector.broadcast %cst_23 : f32 to vector<8x384xf32>
    %47 = arith.mulf %46, %45 : vector<8x384xf32>
    %cst_24 = arith.constant 5.000000e-01 : f32
    %48 = vector.broadcast %cst_24 : f32 to vector<8x384xf32>
    %49 = arith.addf %47, %48 : vector<8x384xf32>
    %50 = vector.extract_strided_slice %41 {offsets = [0, 384], sizes = [8, 128], strides = [1, 1]} : vector<8x512xf32> to vector<8x128xf32>
    %51 = math.tanh %50 : vector<8x128xf32>
    %52 = vector.extract_strided_slice %49 {offsets = [0, 0], sizes = [8, 128], strides = [1, 1]} : vector<8x384xf32> to vector<8x128xf32>
    %53 = vector.extract_strided_slice %49 {offsets = [0, 128], sizes = [8, 128], strides = [1, 1]} : vector<8x384xf32> to vector<8x128xf32>
    %54 = vector.extract_strided_slice %49 {offsets = [0, 256], sizes = [8, 128], strides = [1, 1]} : vector<8x384xf32> to vector<8x128xf32>
    %55 = arith.mulf %53, %32 : vector<8x128xf32>
    %56 = arith.mulf %52, %51 : vector<8x128xf32>
    %57 = arith.addf %55, %56 : vector<8x128xf32>
    %58 = math.tanh %57 : vector<8x128xf32>
    %59 = arith.mulf %54, %58 : vector<8x128xf32>
    %c2_i32 = arith.constant 2 : i32
    %c8_i32_25 = arith.constant 8 : i32
    %60 = arith.muli %c2_i32, %c8_i32_25 : i32
    %61 = tpu.assume_multiple %60, 8 : i32
    %62 = arith.index_cast %61 : i32 to index
    %c0_26 = arith.constant 0 : index
    %63 = vector.load %arg8[%62, %c0_26] : memref<32x512xf32, #tpu.memory_space<vmem>>, vector<8x512xf32>
    %c0_27 = arith.constant 0 : index
    %c0_28 = arith.constant 0 : index
    %64 = vector.load %arg3[%c0_27, %c0_28] : memref<128x512xf32, #tpu.memory_space<vmem>>, vector<128x512xf32>
    %cst_29 = arith.constant dense<0.000000e+00> : vector<8x512xf32>
    %65 = tpu.matmul %59, %64, %cst_29 {dimension_numbers = #tpu.dot_dimension_numbers<[1], [0], [0], [1], [0, 0, 1, 1], [], []>} : vector<8x128xf32>, vector<128x512xf32>, vector<8x512xf32> -> vector<8x512xf32>
    %66 = arith.addf %63, %65 : vector<8x512xf32>
    %67 = vector.extract_strided_slice %66 {offsets = [0, 0], sizes = [8, 384], strides = [1, 1]} : vector<8x512xf32> to vector<8x384xf32>
    %cst_30 = arith.constant 5.000000e-01 : f32
    %68 = vector.broadcast %cst_30 : f32 to vector<8x384xf32>
    %69 = arith.mulf %68, %67 : vector<8x384xf32>
    %70 = math.tanh %69 : vector<8x384xf32>
    %cst_31 = arith.constant 5.000000e-01 : f32
    %71 = vector.broadcast %cst_31 : f32 to vector<8x384xf32>
    %72 = arith.mulf %71, %70 : vector<8x384xf32>
    %cst_32 = arith.constant 5.000000e-01 : f32
    %73 = vector.broadcast %cst_32 : f32 to vector<8x384xf32>
    %74 = arith.addf %72, %73 : vector<8x384xf32>
    %75 = vector.extract_strided_slice %66 {offsets = [0, 384], sizes = [8, 128], strides = [1, 1]} : vector<8x512xf32> to vector<8x128xf32>
    %76 = math.tanh %75 : vector<8x128xf32>
    %77 = vector.extract_strided_slice %74 {offsets = [0, 0], sizes = [8, 128], strides = [1, 1]} : vector<8x384xf32> to vector<8x128xf32>
    %78 = vector.extract_strided_slice %74 {offsets = [0, 128], sizes = [8, 128], strides = [1, 1]} : vector<8x384xf32> to vector<8x128xf32>
    %79 = vector.extract_strided_slice %74 {offsets = [0, 256], sizes = [8, 128], strides = [1, 1]} : vector<8x384xf32> to vector<8x128xf32>
    %80 = arith.mulf %78, %57 : vector<8x128xf32>
    %81 = arith.mulf %77, %76 : vector<8x128xf32>
    %82 = arith.addf %80, %81 : vector<8x128xf32>
    %83 = math.tanh %82 : vector<8x128xf32>
    %84 = arith.mulf %79, %83 : vector<8x128xf32>
    %c3_i32 = arith.constant 3 : i32
    %c8_i32_33 = arith.constant 8 : i32
    %85 = arith.muli %c3_i32, %c8_i32_33 : i32
    %86 = tpu.assume_multiple %85, 8 : i32
    %87 = arith.index_cast %86 : i32 to index
    %c0_34 = arith.constant 0 : index
    %88 = vector.load %arg8[%87, %c0_34] : memref<32x512xf32, #tpu.memory_space<vmem>>, vector<8x512xf32>
    %c0_35 = arith.constant 0 : index
    %c0_36 = arith.constant 0 : index
    %89 = vector.load %arg3[%c0_35, %c0_36] : memref<128x512xf32, #tpu.memory_space<vmem>>, vector<128x512xf32>
    %cst_37 = arith.constant dense<0.000000e+00> : vector<8x512xf32>
    %90 = tpu.matmul %84, %89, %cst_37 {dimension_numbers = #tpu.dot_dimension_numbers<[1], [0], [0], [1], [0, 0, 1, 1], [], []>} : vector<8x128xf32>, vector<128x512xf32>, vector<8x512xf32> -> vector<8x512xf32>
    %91 = arith.addf %88, %90 : vector<8x512xf32>
    %92 = vector.extract_strided_slice %91 {offsets = [0, 0], sizes = [8, 384], strides = [1, 1]} : vector<8x512xf32> to vector<8x384xf32>
    %cst_38 = arith.constant 5.000000e-01 : f32
    %93 = vector.broadcast %cst_38 : f32 to vector<8x384xf32>
    %94 = arith.mulf %93, %92 : vector<8x384xf32>
    %95 = math.tanh %94 : vector<8x384xf32>
    %cst_39 = arith.constant 5.000000e-01 : f32
    %96 = vector.broadcast %cst_39 : f32 to vector<8x384xf32>
    %97 = arith.mulf %96, %95 : vector<8x384xf32>
    %cst_40 = arith.constant 5.000000e-01 : f32
    %98 = vector.broadcast %cst_40 : f32 to vector<8x384xf32>
    %99 = arith.addf %97, %98 : vector<8x384xf32>
    %100 = vector.extract_strided_slice %91 {offsets = [0, 384], sizes = [8, 128], strides = [1, 1]} : vector<8x512xf32> to vector<8x128xf32>
    %101 = math.tanh %100 : vector<8x128xf32>
    %102 = vector.extract_strided_slice %99 {offsets = [0, 0], sizes = [8, 128], strides = [1, 1]} : vector<8x384xf32> to vector<8x128xf32>
    %103 = vector.extract_strided_slice %99 {offsets = [0, 128], sizes = [8, 128], strides = [1, 1]} : vector<8x384xf32> to vector<8x128xf32>
    %104 = vector.extract_strided_slice %99 {offsets = [0, 256], sizes = [8, 128], strides = [1, 1]} : vector<8x384xf32> to vector<8x128xf32>
    %105 = arith.mulf %103, %82 : vector<8x128xf32>
    %106 = arith.mulf %102, %101 : vector<8x128xf32>
    %107 = arith.addf %105, %106 : vector<8x128xf32>
    %108 = math.tanh %107 : vector<8x128xf32>
    %109 = arith.mulf %104, %108 : vector<8x128xf32>
    %c4_i32 = arith.constant 4 : i32
    %c0_41 = arith.constant 0 : index
    %c0_42 = arith.constant 0 : index
    %110 = vector.load %arg5[%c0_41, %c0_42] : memref<128x128xf32, #tpu.memory_space<vmem>>, vector<128x128xf32>
    %cst_43 = arith.constant dense<0.000000e+00> : vector<8x128xf32>
    %111 = tpu.matmul %109, %110, %cst_43 {dimension_numbers = #tpu.dot_dimension_numbers<[1], [0], [0], [1], [0, 0, 1, 1], [], []>} : vector<8x128xf32>, vector<128x128xf32>, vector<8x128xf32> -> vector<8x128xf32>
    %c0_44 = arith.constant 0 : index
    %c0_45 = arith.constant 0 : index
    %112 = vector.load %arg6[%c0_44, %c0_45] : memref<1x128xf32, #tpu.memory_space<vmem>>, vector<1x128xf32>
    %113 = vector.broadcast %112 : vector<1x128xf32> to vector<8x128xf32>
    %114 = arith.addf %111, %113 : vector<8x128xf32>
    %cst_46 = arith.constant dense<0xFF800000> : vector<8xf32>
    %115 = vector.multi_reduction <maximumf>, %114, %cst_46 [1] : vector<8x128xf32> to vector<8xf32>
    %116 = vector.shape_cast %115 : vector<8xf32> to vector<8x1xf32>
    %117 = vector.broadcast %116 : vector<8x1xf32> to vector<8x128xf32>
    %118 = arith.subf %114, %117 : vector<8x128xf32>
    %119 = math.exp %118 : vector<8x128xf32>
    %cst_47 = arith.constant dense<0.000000e+00> : vector<8xf32>
    %120 = vector.multi_reduction <add>, %119, %cst_47 [1] : vector<8x128xf32> to vector<8xf32>
    %121 = vector.shape_cast %120 : vector<8xf32> to vector<8x1xf32>
    %122 = math.log %121 : vector<8x1xf32>
    %123 = vector.broadcast %122 : vector<8x1xf32> to vector<8x128xf32>
    %124 = arith.subf %118, %123 : vector<8x128xf32>
    %c0_48 = arith.constant 0 : index
    %c0_49 = arith.constant 0 : index
    %125 = vector.load %arg7[%c0_48, %c0_49] : memref<8x128xf32, #tpu.memory_space<vmem>>, vector<8x128xf32>
    tpu.vector_store %arg7[%c0_48, %c0_49], %124 {strides = array<i32>} : memref<8x128xf32, #tpu.memory_space<vmem>>, vector<8x128xf32>,
    return
  }
  func.func @transform_0(%arg0: i32) -> (i32, i32, i32) {
    %c0_i32 = arith.constant 0 : i32
    %c0_i32_0 = arith.constant 0 : i32
    %c0_i32_1 = arith.constant 0 : i32
    return %c0_i32, %arg0, %c0_i32_0 : i32, i32, i32
  }
  func.func @transform_1(%arg0: i32) -> (i32, i32) {
    %c0_i32 = arith.constant 0 : i32
    %c0_i32_0 = arith.constant 0 : i32
    %c0_i32_1 = arith.constant 0 : i32
    return %c0_i32, %c0_i32_0 : i32, i32
  }
  func.func @transform_2(%arg0: i32) -> (i32, i32) {
    %c0_i32 = arith.constant 0 : i32
    %c0_i32_0 = arith.constant 0 : i32
    %c0_i32_1 = arith.constant 0 : i32
    return %c0_i32, %c0_i32_0 : i32, i32
  }
  func.func @transform_3(%arg0: i32) -> (i32, i32) {
    %c0_i32 = arith.constant 0 : i32
    %c0_i32_0 = arith.constant 0 : i32
    %c0_i32_1 = arith.constant 0 : i32
    return %c0_i32, %c0_i32_0 : i32, i32
  }
  func.func @transform_4(%arg0: i32) -> (i32, i32) {
    %c0_i32 = arith.constant 0 : i32
    %c0_i32_0 = arith.constant 0 : i32
    %c0_i32_1 = arith.constant 0 : i32
    return %c0_i32, %c0_i32_0 : i32, i32
  }
  func.func @transform_5(%arg0: i32) -> (i32, i32) {
    %c0_i32 = arith.constant 0 : i32
    %c0_i32_0 = arith.constant 0 : i32
    %c0_i32_1 = arith.constant 0 : i32
    return %c0_i32, %c0_i32_0 : i32, i32
  }
  func.func @transform_6(%arg0: i32) -> (i32, i32) {
    %c0_i32 = arith.constant 0 : i32
    %c0_i32_0 = arith.constant 0 : i32
    return %arg0, %c0_i32 : i32, i32
  }
}

</mosaic_0001>

<bundles_post_ra>
// kernel: tpu_custom_call.1
= control target key start
LH: loop header
LB: loop body
LE: loop exit
PB: predicated region body
PF: predicated region fallthrough
CT: control target
= control target key end

     0   :  { %11 = vsyncpa [#allocation4], 0  ;;  %s1596_s0 = inlined_call_operand.hbm [shape: f32[4,8,28], index: 0, kind: input, shape index: {}]   ;;  %s1597_s1 = inlined_call_operand.hbm [shape: f32[28,512], index: 1, kind: input, shape index: {}]   ;;  %s1598_s2 = inlined_call_operand.hbm [shape: f32[128,512], index: 2, kind: input, shape index: {}]   ;;  %s1599_s3 = inlined_call_operand.hbm [shape: f32[1,512], index: 3, kind: input, shape index: {}]   ;;  %s1600_s4 = inlined_call_operand.hbm [shape: f32[128,128], index: 4, kind: input, shape index: {}]   ;;  %s1601_s5 = inlined_call_operand.vmem [shape: f32[1,128], index: 5, kind: input, shape index: {}]   ;;  %s1602_s6 = inlined_call_operand.hbm [shape: f32[8,128], index: 6, kind: output, shape index: {}]  }
   0x1   :  { %12 = vsyncpa [#allocation7], 0 }
   0x2   :  { %13 = vsyncpa [#allocation10], 0  ;;  %s32_s23 = sshll.u32 %s1597_s1, 4  ;;  %s33_s23 = int_to_ptr.hbm [resolvable:$true] %s32_s23 }
   0x3   :  { %14 = vsyncpa [#allocation5], 0  ;;  %s1089_s24 = smov [#allocation6]   ;;  %s59_s28 = sshll.u32 %s1599_s3, 4  ;;  %s60_s28 = int_to_ptr.hbm [resolvable:$true] %s59_s28 }
   0x4   :  { %s34_s25 = sshll.u32 %s1089_s24, 4  ;;  %s1090_s29 = smov 512   ;;  %s35_s25 = int_to_ptr.vmem [resolvable:$true] %s34_s25 }
   0x5   :  { %s1091_s30 = smov 32   ;;  %s1092_s7 = smov [#allocation9]  }
   0x6   :  { %40 = dma.hbm_to_vmem [thread:$0]  %s33_s23, 2048, %s35_s25, [#allocation7], %s1090_s29, %s1090_s29, %s1091_s30  }
   0x7   :  { %s61_s8 = sshll.u32 %s1092_s7, 4  ;;  %s19_s11 = sshll.u32 %s1596_s0, 4  ;;  %s62_s8 = int_to_ptr.vmem [resolvable:$true] %s61_s8  ;;  %s20_s11 = int_to_ptr.hbm [resolvable:$true] %s19_s11 }
   0x8   :  { %64 = dma.hbm_to_vmem [thread:$0]  %s60_s28, 64, %s62_s8, [#allocation10]  }
   0x9   :  { %s1093_s1 = smov [#allocation3]   ;;  %s45_s3 = sshll.u32 %s1598_s2, 4  ;;  %s46_s3 = int_to_ptr.hbm [resolvable:$true] %s45_s3 }
   0xa   :  { %s21_s12 = sshll.u32 %s1093_s1, 4  ;;  %s1094_s15 = smov 128   ;;  %s22_s12 = int_to_ptr.vmem [resolvable:$true] %s21_s12 }
   0xb   :  { %s1095_s16 = smov 8   ;;  %s1096_s17 = smov [#allocation8]  }
   0xc   :  { %27 = dma.hbm_to_vmem [thread:$0]  %s20_s11, 512, %s22_s12, [#allocation4], %s1094_s15, %s1094_s15, %s1095_s16  }
   0xd   :  { %s47_s18 = sshll.u32 %s1096_s17, 4  ;;  %s69_s0 = sshll.u32 %s1600_s4, 4  ;;  %s48_s18 = int_to_ptr.vmem [resolvable:$true] %s47_s18  ;;  %s70_s0 = int_to_ptr.hbm [resolvable:$true] %s69_s0 }
   0xe   :  { %53 = dma.hbm_to_vmem [thread:$0]  %s46_s3, 8192, %s48_s18, [#allocation7], %s1090_s29, %s1090_s29, %s1091_s30  }
   0xf   :  { %s1097_s21 = smov [#allocation11]  }
  0x10   :  { %s71_s22 = sshll.u32 %s1097_s21, 4  ;;  %s72_s22 = int_to_ptr.vmem [resolvable:$true] %s71_s22 }
  0x11   :  { %77 = dma.hbm_to_vmem [thread:$0]  %s70_s0, 2048, %s72_s22, [#allocation10], %s1094_s15, %s1094_s15, %s1095_s16  }
  0x12   :  { %1081 = dma.done.wait [#allocation4], 512  }
  0x13   :  { %1082 = vsyncadd [#allocation4], 4294966784 }
  0x14   :  { %1083 = dma.done.wait [#allocation7], 10240  }
  0x15   :  { %1084 = vsyncadd [#allocation7], 4294957056 }
  0x16   :  { %1085 = dma.done.wait [#allocation10], 2112  }
  0x17   :  { %1086 = vsyncadd [#allocation10], 4294965184  ;;  %vm143_vm0 = vcmask 1043456   ;;  %v116_v0 = vld [vmem:[#allocation6 + $0x60] sm:$0xf]  ;;  %v113_v5 = vld [vmem:[#allocation6 + $0x48] sm:$0xff] }
  0x18   :  { %v117_v1 = vld [vmem:[#allocation6 + $0x68] sm:$0xf]  ;;  %v118_v2 = vld [vmem:[#allocation6 + $0x70] sm:$0xf]  ;;  %861 = vmatpush.msk.msra.mxu0 %vm143_vm0, %v116_v0  ;;  %v119_v3 = vld [vmem:[#allocation6 + $0x78] sm:$0xf] }
  0x19   :  { %866 = vmatpush.msk.msra.mxu1 %vm143_vm0, %v117_v1  ;;  %v112_v4 = vld [vmem:[#allocation6 + $0x40] sm:$0xff]  ;;  %871 = vmatpush.msk.msra.mxu2 %vm143_vm0, %v118_v2  ;;  %v114_v6 = vld [vmem:[#allocation6 + $0x50] sm:$0xff]  ;;  %v115_v7 = vld [vmem:[#allocation6 + $0x58] sm:$0xff]  ;;  %vm130_vm1 = vcmask 228352   ;;  %s1099_s23 = smov [#allocation12]   ;;  %s846_s27 = sshll.u32 %s1602_s6, 4  ;;  %s847_s27 = int_to_ptr.hbm [resolvable:$true] %s846_s27 }
  0x1a   :  { %876 = vmatpush.msk.msra.mxu3 %vm143_vm0, %v119_v3  ;;  %v108_v8 = vld [vmem:[#allocation6 + $0x20] sm:$0xff]  ;;  %169 = vmatpush.msra.mxu0 %v112_v4  ;;  %v109_v9 = vld [vmem:[#allocation6 + $0x28] sm:$0xff]  ;;  %v110_v10 = vld [vmem:[#allocation6 + $0x30] sm:$0xff]  ;;  %s844_s24 = sshll.u32 %s1099_s23, 4  ;;  %s845_s24 = int_to_ptr.vmem [resolvable:$true] %s844_s24 }
  0x1b   :  { %198 = vmatpush.msra.mxu1 %v113_v5  ;;  %v111_v11 = vld [vmem:[#allocation6 + $0x38] sm:$0xff]  ;;  %227 = vmatpush.msra.mxu2 %v114_v6  ;;  %v104_v12 = vld [vmem:[#allocation6] sm:$0xff]  ;;  %v105_v13 = vld [vmem:[#allocation6 + $0x8] sm:$0xff] }
  0x1c   :  { %256 = vmatpush.msra.mxu3 %v115_v7  ;;  %170 = vmatpush.msra.mxu0 %v108_v8  ;;  %v106_v14 = vld [vmem:[#allocation6 + $0x10] sm:$0xff]  ;;  %v107_v15 = vld [vmem:[#allocation6 + $0x18] sm:$0xff]  ;;  %v100_v16 = vld [vmem:[#allocation3] sm:$0xff] }
  0x1d   :  { %199 = vmatpush.msra.mxu1 %v109_v9  ;;  %228 = vmatpush.msra.mxu2 %v110_v10  ;;  %v1150_v17 = vld [vmem:[#allocation8 + $0x1e0] sm:$0xff]  ;;  %v1152_v18 = vld [vmem:[#allocation8 + $0x1e8] sm:$0xff]  ;;  %v1156_v19 = vld [vmem:[#allocation8 + $0x1f8] sm:$0xff] }
  0x1e   :  { %257 = vmatpush.msra.mxu3 %v111_v11  ;;  %171 = vmatpush.msra.mxu0 %v104_v12  ;;  %v1158_v20 = vld [vmem:[#allocation8 + $0x1f0] sm:$0xff]  ;;  %v1162_v21 = vld [vmem:[#allocation8 + $0x1c0] sm:$0xff]  ;;  %v1164_v22 = vld [vmem:[#allocation8 + $0x1c8] sm:$0xff] }
  0x1f   :  { %200 = vmatpush.msra.mxu1 %v105_v13  ;;  %229 = vmatpush.msra.mxu2 %v106_v14  ;;  %v1168_v23 = vld [vmem:[#allocation8 + $0x1d8] sm:$0xff]  ;;  %v1170_v24 = vld [vmem:[#allocation8 + $0x1d0] sm:$0xff]  ;;  %v1174_v25 = vld [vmem:[#allocation8 + $0x1a0] sm:$0xff] }
  0x20   :  { %258 = vmatpush.msra.mxu3 %v107_v15  ;;  %862 = vmatmul.msk.f32.vlgmr.msra.gmra.mxu0 %vm130_vm1, %v100_v16  ;;  %v1176_v26 = vld [vmem:[#allocation8 + $0x1a8] sm:$0xff]  ;;  %v1180_v27 = vld [vmem:[#allocation8 + $0x1b8] sm:$0xff]  ;;  %v1182_v28 = vld [vmem:[#allocation8 + $0x1b0] sm:$0xff] }
  0x21   :  { %867 = vmatmul.msk.f32.vlgmr.msra.gmra.mxu1 %vm130_vm1, %v100_v16  ;;  %872 = vmatmul.msk.f32.vlgmr.msra.gmra.mxu2 %vm130_vm1, %v100_v16  ;;  %v1186_v29 = vld [vmem:[#allocation8 + $0x180] sm:$0xff]  ;;  %v1188_v30 = vld [vmem:[#allocation8 + $0x188] sm:$0xff]  ;;  %v1192_v31 = vld [vmem:[#allocation8 + $0x198] sm:$0xff] }
  0x22   :  { %877 = vmatmul.msk.f32.vlgmr.msra.gmra.mxu3 %vm130_vm1, %v100_v16  ;;  %359 = vmatpush.msrb.mxu0 %v1150_v17  ;;  %v1194_v32 = vld [vmem:[#allocation8 + $0x190] sm:$0xff]  ;;  %v101_v33 = vld [vmem:[#allocation3 + $0x8] sm:$0xff]  ;;  %v1202_v34 = vld [vmem:[#allocation8 + $0x160] sm:$0xff] }
  0x23   :  { %379 = vmatpush.msrb.mxu1 %v1152_v18  ;;  %419 = vmatpush.msrb.mxu3 %v1156_v19  ;;  %v1204_v35 = vld [vmem:[#allocation8 + $0x168] sm:$0xff]  ;;  %v1208_v36 = vld [vmem:[#allocation8 + $0x178] sm:$0xff]  ;;  %v1210_v37 = vld [vmem:[#allocation8 + $0x170] sm:$0xff] }
  0x24   :  { %399 = vmatpush.msrb.mxu2 %v1158_v20  ;;  %360 = vmatpush.msrb.mxu0 %v1162_v21  ;;  %v1214_v38 = vld [vmem:[#allocation8 + $0x140] sm:$0xff]  ;;  %v1216_v39 = vld [vmem:[#allocation8 + $0x148] sm:$0xff]  ;;  %v1220_v40 = vld [vmem:[#allocation8 + $0x158] sm:$0xff] }
  0x25   :  { %380 = vmatpush.msrb.mxu1 %v1164_v22  ;;  %420 = vmatpush.msrb.mxu3 %v1168_v23  ;;  %v1222_v41 = vld [vmem:[#allocation8 + $0x150] sm:$0xff]  ;;  %v1226_v42 = vld [vmem:[#allocation8 + $0x120] sm:$0xff]  ;;  %v1228_v43 = vld [vmem:[#allocation8 + $0x128] sm:$0xff] }
  0x26   :  { %400 = vmatpush.msrb.mxu2 %v1170_v24  ;;  %361 = vmatpush.msrb.mxu0 %v1174_v25  ;;  %v1232_v44 = vld [vmem:[#allocation8 + $0x138] sm:$0xff]  ;;  %v1234_v45 = vld [vmem:[#allocation8 + $0x130] sm:$0xff]  ;;  %v1238_v46 = vld [vmem:[#allocation8 + $0x100] sm:$0xff] }
  0x27   :  { %381 = vmatpush.msrb.mxu1 %v1176_v26  ;;  %421 = vmatpush.msrb.mxu3 %v1180_v27  ;;  %v1240_v47 = vld [vmem:[#allocation8 + $0x108] sm:$0xff]  ;;  %v1244_v48 = vld [vmem:[#allocation8 + $0x118] sm:$0xff]  ;;  %v1246_v49 = vld [vmem:[#allocation8 + $0x110] sm:$0xff] }
  0x28   :  { %401 = vmatpush.msrb.mxu2 %v1182_v28  ;;  %362 = vmatpush.msrb.mxu0 %v1186_v29  ;;  %v102_v50 = vld [vmem:[#allocation3 + $0x10] sm:$0xff]  ;;  %v1254_v51 = vld [vmem:[#allocation8 + $0xe0] sm:$0xff]  ;;  %v1256_v52 = vld [vmem:[#allocation8 + $0xe8] sm:$0xff] }
  0x29   :  { %382 = vmatpush.msrb.mxu1 %v1188_v30  ;;  %422 = vmatpush.msrb.mxu3 %v1192_v31  ;;  %v1260_v53 = vld [vmem:[#allocation8 + $0xf8] sm:$0xff]  ;;  %v1262_v54 = vld [vmem:[#allocation8 + $0xf0] sm:$0xff]  ;;  %v1266_v55 = vld [vmem:[#allocation8 + $0xc0] sm:$0xff] }
  0x2a   :  { %402 = vmatpush.msrb.mxu2 %v1194_v32  ;;  %863 = vmatmul.msk.f32.gmra.mxu0 %vm130_vm1, %v101_v33  ;;  %v1268_v56 = vld [vmem:[#allocation8 + $0xc8] sm:$0xff]  ;;  %v1272_v57 = vld [vmem:[#allocation8 + $0xd8] sm:$0xff]  ;;  %v1274_v58 = vld [vmem:[#allocation8 + $0xd0] sm:$0xff] }
  0x2b   :  { %868 = vmatmul.msk.f32.gmra.mxu1 %vm130_vm1, %v101_v33  ;;  %873 = vmatmul.msk.f32.gmra.mxu2 %vm130_vm1, %v101_v33  ;;  %1631 = vst [vmem:[#allocation17_spill] sm:$0xff] %v1272_v57  ;;  %v1278_v59 = vld [vmem:[#allocation8 + $0xa0] sm:$0xff]  ;;  %v1280_v60 = vld [vmem:[#allocation8 + $0xa8] sm:$0xff]  ;;  %v1284_v61 = vld [vmem:[#allocation8 + $0xb8] sm:$0xff] }
  0x2c   :  { %878 = vmatmul.msk.f32.gmra.mxu3 %vm130_vm1, %v101_v33  ;;  %363 = vmatpush.msrb.mxu0 %v1202_v34  ;;  %1632 = vst [vmem:[#allocation18_spill] sm:$0xff] %v1274_v58  ;;  %v1286_v62 = vld [vmem:[#allocation8 + $0xb0] sm:$0xff]  ;;  %v1290_v63 = vld [vmem:[#allocation8 + $0x80] sm:$0xff]  ;;  %v1292_v0 = vld [vmem:[#allocation8 + $0x88] sm:$0xff] }
  0x2d   :  { %383 = vmatpush.msrb.mxu1 %v1204_v35  ;;  %423 = vmatpush.msrb.mxu3 %v1208_v36  ;;  %1633 = vst [vmem:[#allocation19_spill] sm:$0xff] %v1278_v59  ;;  %v1296_v1 = vld [vmem:[#allocation8 + $0x98] sm:$0xff]  ;;  %v1298_v2 = vld [vmem:[#allocation8 + $0x90] sm:$0xff]  ;;  %v1306_v4 = vld [vmem:[#allocation8 + $0x60] sm:$0xff] }
  0x2e   :  { %403 = vmatpush.msrb.mxu2 %v1210_v37  ;;  %364 = vmatpush.msrb.mxu0 %v1214_v38  ;;  %1634 = vst [vmem:[#allocation20_spill] sm:$0xff] %v1280_v60  ;;  %v103_v3 = vld [vmem:[#allocation3 + $0x18] sm:$0xff]  ;;  %v1308_v5 = vld [vmem:[#allocation8 + $0x68] sm:$0xff]  ;;  %v1314_v7 = vld [vmem:[#allocation8 + $0x70] sm:$0xff] }
  0x2f   :  { %384 = vmatpush.msrb.mxu1 %v1216_v39  ;;  %424 = vmatpush.msrb.mxu3 %v1220_v40  ;;  %1635 = vst [vmem:[#allocation21_spill] sm:$0xff] %v1284_v61  ;;  %v1312_v6 = vld [vmem:[#allocation8 + $0x78] sm:$0xff]  ;;  %v1318_v8 = vld [vmem:[#allocation8 + $0x40] sm:$0xff]  ;;  %v1320_v9 = vld [vmem:[#allocation8 + $0x48] sm:$0xff] }
  0x30   :  { %404 = vmatpush.msrb.mxu2 %v1222_v41  ;;  %365 = vmatpush.msrb.mxu0 %v1226_v42  ;;  %1636 = vst [vmem:[#allocation22_spill] sm:$0xff] %v1286_v62  ;;  %v1324_v10 = vld [vmem:[#allocation8 + $0x58] sm:$0xff]  ;;  %v1326_v11 = vld [vmem:[#allocation8 + $0x50] sm:$0xff]  ;;  %v1330_v12 = vld [vmem:[#allocation8 + $0x20] sm:$0xff] }
  0x31   :  { %385 = vmatpush.msrb.mxu1 %v1228_v43  ;;  %425 = vmatpush.msrb.mxu3 %v1232_v44  ;;  %1637 = vst [vmem:[#allocation23_spill] sm:$0xff] %v1290_v63  ;;  %v1332_v13 = vld [vmem:[#allocation8 + $0x28] sm:$0xff]  ;;  %v1336_v14 = vld [vmem:[#allocation8 + $0x38] sm:$0xff]  ;;  %v1338_v15 = vld [vmem:[#allocation8 + $0x30] sm:$0xff] }
  0x32   :  { %405 = vmatpush.msrb.mxu2 %v1234_v45  ;;  %366 = vmatpush.msrb.mxu0 %v1238_v46  ;;  %1638 = vst [vmem:[#allocation24_spill] sm:$0xff] %v1292_v0  ;;  %v1342_v16 = vld [vmem:[#allocation8] sm:$0xff]  ;;  %v1344_v33 = vld [vmem:[#allocation8 + $0x8] sm:$0xff] }
  0x33   :  { %386 = vmatpush.msrb.mxu1 %v1240_v47  ;;  %426 = vmatpush.msrb.mxu3 %v1244_v48  ;;  %1639 = vst [vmem:[#allocation25_spill] sm:$0xff] %v1296_v1 }
  0x34   :  { %406 = vmatpush.msrb.mxu2 %v1246_v49  ;;  %864 = vmatmul.msk.f32.gmra.mxu0 %vm130_vm1, %v102_v50  ;;  %1640 = vst [vmem:[#allocation26_spill] sm:$0xff] %v1298_v2 }
  0x35   :  { %869 = vmatmul.msk.f32.gmra.mxu1 %vm130_vm1, %v102_v50  ;;  %874 = vmatmul.msk.f32.gmra.mxu2 %vm130_vm1, %v102_v50  ;;  %1641 = vst [vmem:[#allocation27_spill] sm:$0xff] %v1306_v4 }
  0x36   :  { %879 = vmatmul.msk.f32.gmra.mxu3 %vm130_vm1, %v102_v50  ;;  %367 = vmatpush.msrb.mxu0 %v1254_v51  ;;  %1642 = vst [vmem:[#allocation28_spill] sm:$0xff] %v1308_v5  ;;  %v1348_v50 = vld [vmem:[#allocation8 + $0x18] sm:$0xff] }
  0x37   :  { %387 = vmatpush.msrb.mxu1 %v1256_v52  ;;  %427 = vmatpush.msrb.mxu3 %v1260_v53  ;;  %1643 = vst [vmem:[#allocation29_spill] sm:$0xff] %v1312_v6 }
  0x38   :  { %407 = vmatpush.msrb.mxu2 %v1262_v54  ;;  %368 = vmatpush.msrb.mxu0 %v1266_v55  ;;  %1644 = vst [vmem:[#allocation30_spill] sm:$0xff] %v1314_v7 }
  0x39   :  { %388 = vmatpush.msrb.mxu1 %v1268_v56  ;;  %428 = vmatpush.msrb.mxu3 %v1272_v57  ;;  %1645 = vst [vmem:[#allocation31_spill] sm:$0xff] %v1318_v8 }
  0x3a   :  { %408 = vmatpush.msrb.mxu2 %v1274_v58  ;;  %369 = vmatpush.msrb.mxu0 %v1278_v59  ;;  %1646 = vst [vmem:[#allocation32_spill] sm:$0xff] %v1320_v9 }
  0x3b   :  { %389 = vmatpush.msrb.mxu1 %v1280_v60  ;;  %429 = vmatpush.msrb.mxu3 %v1284_v61  ;;  %1647 = vst [vmem:[#allocation33_spill] sm:$0xff] %v1324_v10 }
  0x3c   :  { %409 = vmatpush.msrb.mxu2 %v1286_v62  ;;  %370 = vmatpush.msrb.mxu0 %v1290_v63  ;;  %1648 = vst [vmem:[#allocation34_spill] sm:$0xff] %v1326_v11 }
  0x3d   :  { %390 = vmatpush.msrb.mxu1 %v1292_v0  ;;  %430 = vmatpush.msrb.mxu3 %v1296_v1  ;;  %1649 = vst [vmem:[#allocation35_spill] sm:$0xff] %v1330_v12 }
  0x3e   :  { %410 = vmatpush.msrb.mxu2 %v1298_v2  ;;  %865 = vmatmul.msk.f32.gmra.mxu0 %vm130_vm1, %v103_v3  ;;  %1650 = vst [vmem:[#allocation36_spill] sm:$0xff] %v1332_v13 }
  0x3f   :  { %870 = vmatmul.msk.f32.gmra.mxu1 %vm130_vm1, %v103_v3  ;;  %875 = vmatmul.msk.f32.gmra.mxu2 %vm130_vm1, %v103_v3  ;;  %1651 = vst [vmem:[#allocation37_spill] sm:$0xff] %v1336_v14 }
  0x40   :  { %880 = vmatmul.msk.f32.gmra.mxu3 %vm130_vm1, %v103_v3  ;;  %371 = vmatpush.msrb.mxu0 %v1306_v4  ;;  %1652 = vst [vmem:[#allocation38_spill] sm:$0xff] %v1338_v15  ;;  %v1350_v3 = vld [vmem:[#allocation8 + $0x10] sm:$0xff] }
  0x41   :  { %391 = vmatpush.msrb.mxu1 %v1308_v5  ;;  %431 = vmatpush.msrb.mxu3 %v1312_v6  ;;  %1653 = vst [vmem:[#allocation39_spill] sm:$0xff] %v1342_v16 }
  0x42   :  { %411 = vmatpush.msrb.mxu2 %v1314_v7  ;;  %372 = vmatpush.msrb.mxu0 %v1318_v8  ;;  %1654 = vst [vmem:[#allocation40_spill] sm:$0xff] %v1344_v33 }
  0x43   :  { %392 = vmatpush.msrb.mxu1 %v1320_v9  ;;  %432 = vmatpush.msrb.mxu3 %v1324_v10  ;;  %1655 = vst [vmem:[#allocation41_spill] sm:$0xff] %v1348_v50  ;;  %v1098_v10 = vmov 0.0  }
  0x44   :  { %412 = vmatpush.msrb.mxu2 %v1326_v11  ;;  %373 = vmatpush.msrb.mxu0 %v1330_v12  ;;  %1656 = vst [vmem:[#allocation42_spill] sm:$0xff] %v1350_v3 }
  0x45   :  { %393 = vmatpush.msrb.mxu1 %v1332_v13  ;;  %433 = vmatpush.msrb.mxu3 %v1336_v14 }
  0x46   :  { %413 = vmatpush.msrb.mxu2 %v1338_v15  ;;  %374 = vmatpush.msrb.mxu0 %v1342_v16 }
  0x47   :  { %394 = vmatpush.msrb.mxu1 %v1344_v33  ;;  %434 = vmatpush.msrb.mxu3 %v1348_v50 }
  0x48   :  { %414 = vmatpush.msrb.mxu2 %v1350_v3  ;;  %375 = vmatmul.f32.vlgmr.msrb.gmra.mxu0 %v1098_v10 }
  0x49   :  { %395 = vmatmul.f32.vlgmr.msrb.gmra.mxu1 %v1098_v10  ;;  %415 = vmatmul.f32.vlgmr.msrb.gmra.mxu2 %v1098_v10 }
  0x4a   :  { %435 = vmatmul.f32.vlgmr.msrb.gmra.mxu3 %v1098_v10  ;;  %468 = vmatpush.msra.mxu0 %v1150_v17  ;;  %v1657_v10 = vld [vmem:[#allocation33_spill] sm:$0xff] }
  0x4b   :  { %488 = vmatpush.msra.mxu1 %v1152_v18  ;;  %508 = vmatpush.msra.mxu2 %v1158_v20 }
  0x4c   :  { %528 = vmatpush.msra.mxu3 %v1156_v19  ;;  %469 = vmatpush.msra.mxu0 %v1162_v21 }
  0x4d   :  { %489 = vmatpush.msra.mxu1 %v1164_v22  ;;  %509 = vmatpush.msra.mxu2 %v1170_v24 }
  0x4e   :  { %529 = vmatpush.msra.mxu3 %v1168_v23  ;;  %470 = vmatpush.msra.mxu0 %v1174_v25 }
  0x4f   :  { %490 = vmatpush.msra.mxu1 %v1176_v26  ;;  %510 = vmatpush.msra.mxu2 %v1182_v28 }
  0x50   :  { %530 = vmatpush.msra.mxu3 %v1180_v27  ;;  %471 = vmatpush.msra.mxu0 %v1186_v29 }
  0x51   :  { %491 = vmatpush.msra.mxu1 %v1188_v30  ;;  %511 = vmatpush.msra.mxu2 %v1194_v32 }
  0x52   :  { %531 = vmatpush.msra.mxu3 %v1192_v31  ;;  %472 = vmatpush.msra.mxu0 %v1202_v34 }
  0x53   :  { %492 = vmatpush.msra.mxu1 %v1204_v35  ;;  %512 = vmatpush.msra.mxu2 %v1210_v37 }
  0x54   :  { %532 = vmatpush.msra.mxu3 %v1208_v36  ;;  %473 = vmatpush.msra.mxu0 %v1214_v38 }
  0x55   :  { %493 = vmatpush.msra.mxu1 %v1216_v39  ;;  %513 = vmatpush.msra.mxu2 %v1222_v41 }
  0x56   :  { %533 = vmatpush.msra.mxu3 %v1220_v40  ;;  %474 = vmatpush.msra.mxu0 %v1226_v42 }
  0x57   :  { %494 = vmatpush.msra.mxu1 %v1228_v43  ;;  %514 = vmatpush.msra.mxu2 %v1234_v45 }
  0x58   :  { %534 = vmatpush.msra.mxu3 %v1232_v44  ;;  %475 = vmatpush.msra.mxu0 %v1238_v46 }
  0x59   :  { %495 = vmatpush.msra.mxu1 %v1240_v47  ;;  %515 = vmatpush.msra.mxu2 %v1246_v49 }
  0x5a   :  { %535 = vmatpush.msra.mxu3 %v1244_v48  ;;  %476 = vmatpush.msra.mxu0 %v1254_v51 }
  0x5b   :  { %496 = vmatpush.msra.mxu1 %v1256_v52  ;;  %516 = vmatpush.msra.mxu2 %v1262_v54 }
  0x5c   :  { %536 = vmatpush.msra.mxu3 %v1260_v53  ;;  %477 = vmatpush.msra.mxu0 %v1266_v55 }
  0x5d   :  { %497 = vmatpush.msra.mxu1 %v1268_v56  ;;  %517 = vmatpush.msra.mxu2 %v1274_v58 }
  0x5e   :  { %537 = vmatpush.msra.mxu3 %v1272_v57  ;;  %478 = vmatpush.msra.mxu0 %v1278_v59 }
  0x5f   :  { %498 = vmatpush.msra.mxu1 %v1280_v60  ;;  %518 = vmatpush.msra.mxu2 %v1286_v62 }
  0x60   :  { %538 = vmatpush.msra.mxu3 %v1284_v61  ;;  %479 = vmatpush.msra.mxu0 %v1290_v63 }
  0x61   :  { %499 = vmatpush.msra.mxu1 %v1292_v0  ;;  %519 = vmatpush.msra.mxu2 %v1298_v2 }
  0x62   :  { %539 = vmatpush.msra.mxu3 %v1296_v1  ;;  %480 = vmatpush.msra.mxu0 %v1306_v4 }
  0x63   :  { %500 = vmatpush.msra.mxu1 %v1308_v5  ;;  %520 = vmatpush.msra.mxu2 %v1314_v7 }
  0x64   :  { %540 = vmatpush.msra.mxu3 %v1312_v6  ;;  %481 = vmatpush.msra.mxu0 %v1318_v8 }
  0x65   :  { %501 = vmatpush.msra.mxu1 %v1320_v9  ;;  %521 = vmatpush.msra.mxu2 %v1326_v11 }
  0x66   :  { %541 = vmatpush.msra.mxu3 %v1657_v10  ;;  %482 = vmatpush.msra.mxu0 %v1330_v12 }
  0x67   :  { %502 = vmatpush.msra.mxu1 %v1332_v13  ;;  %522 = vmatpush.msra.mxu2 %v1338_v15 }
  0x68   :  { %542 = vmatpush.msra.mxu3 %v1336_v14  ;;  %483 = vmatpush.msra.mxu0 %v1342_v16 }
  0x69   :  { %503 = vmatpush.msra.mxu1 %v1344_v33  ;;  %523 = vmatpush.msra.mxu2 %v1350_v3 }
  0x6a   :  { %543 = vmatpush.msra.mxu3 %v1348_v50  ;;  %577 = vmatpush.msrb.mxu0 %v1150_v17 }
  0x6b   :  { %597 = vmatpush.msrb.mxu1 %v1152_v18  ;;  %617 = vmatpush.msrb.mxu2 %v1158_v20 }
  0x6c   :  { %637 = vmatpush.msrb.mxu3 %v1156_v19  ;;  %578 = vmatpush.msrb.mxu0 %v1162_v21 }
  0x6d   :  { %598 = vmatpush.msrb.mxu1 %v1164_v22  ;;  %618 = vmatpush.msrb.mxu2 %v1170_v24 }
  0x6e   :  { %638 = vmatpush.msrb.mxu3 %v1168_v23  ;;  %579 = vmatpush.msrb.mxu0 %v1174_v25 }
  0x6f   :  { %599 = vmatpush.msrb.mxu1 %v1176_v26  ;;  %619 = vmatpush.msrb.mxu2 %v1182_v28 }
  0x70   :  { %639 = vmatpush.msrb.mxu3 %v1180_v27  ;;  %580 = vmatpush.msrb.mxu0 %v1186_v29 }
  0x71   :  { %600 = vmatpush.msrb.mxu1 %v1188_v30  ;;  %620 = vmatpush.msrb.mxu2 %v1194_v32 }
  0x72   :  { %640 = vmatpush.msrb.mxu3 %v1192_v31  ;;  %581 = vmatpush.msrb.mxu0 %v1202_v34 }
  0x73   :  { %601 = vmatpush.msrb.mxu1 %v1204_v35  ;;  %621 = vmatpush.msrb.mxu2 %v1210_v37 }
  0x74   :  { %641 = vmatpush.msrb.mxu3 %v1208_v36  ;;  %582 = vmatpush.msrb.mxu0 %v1214_v38 }
  0x75   :  { %602 = vmatpush.msrb.mxu1 %v1216_v39  ;;  %622 = vmatpush.msrb.mxu2 %v1222_v41 }
  0x76   :  { %642 = vmatpush.msrb.mxu3 %v1220_v40  ;;  %583 = vmatpush.msrb.mxu0 %v1226_v42 }
  0x77   :  { %603 = vmatpush.msrb.mxu1 %v1228_v43  ;;  %623 = vmatpush.msrb.mxu2 %v1234_v45 }
  0x78   :  { %643 = vmatpush.msrb.mxu3 %v1232_v44  ;;  %584 = vmatpush.msrb.mxu0 %v1238_v46 }
  0x79   :  { %604 = vmatpush.msrb.mxu1 %v1240_v47  ;;  %624 = vmatpush.msrb.mxu2 %v1246_v49 }
  0x7a   :  { %644 = vmatpush.msrb.mxu3 %v1244_v48  ;;  %585 = vmatpush.msrb.mxu0 %v1254_v51 }
  0x7b   :  { %605 = vmatpush.msrb.mxu1 %v1256_v52  ;;  %625 = vmatpush.msrb.mxu2 %v1262_v54 }
  0x7c   :  { %645 = vmatpush.msrb.mxu3 %v1260_v53  ;;  %586 = vmatpush.msrb.mxu0 %v1266_v55 }
  0x7d   :  { %606 = vmatpush.msrb.mxu1 %v1268_v56  ;;  %626 = vmatpush.msrb.mxu2 %v1274_v58 }
  0x7e   :  { %646 = vmatpush.msrb.mxu3 %v1272_v57  ;;  %587 = vmatpush.msrb.mxu0 %v1278_v59 }
  0x7f   :  { %607 = vmatpush.msrb.mxu1 %v1280_v60  ;;  %627 = vmatpush.msrb.mxu2 %v1286_v62 }
  0x80   :  { %647 = vmatpush.msrb.mxu3 %v1284_v61  ;;  %588 = vmatpush.msrb.mxu0 %v1290_v63 }
  0x81   :  { %608 = vmatpush.msrb.mxu1 %v1292_v0  ;;  %628 = vmatpush.msrb.mxu2 %v1298_v2 }
  0x82   :  { %648 = vmatpush.msrb.mxu3 %v1296_v1  ;;  %589 = vmatpush.msrb.mxu0 %v1306_v4 }
  0x83   :  { %609 = vmatpush.msrb.mxu1 %v1308_v5  ;;  %629 = vmatpush.msrb.mxu2 %v1314_v7 }
  0x84   :  { %649 = vmatpush.msrb.mxu3 %v1312_v6  ;;  %590 = vmatpush.msrb.mxu0 %v1318_v8  ;;  %v120_v8 = vld [vmem:[#allocation9] sm:$0xf] }
  0x85   :  { %610 = vmatpush.msrb.mxu1 %v1320_v9  ;;  %630 = vmatpush.msrb.mxu2 %v1326_v11  ;;  %v123_v7 = vperm.slane %v120_v8, 1  ;;  %v125_v4 = vperm.slane %v120_v8, 3 }
  0x86   :  { %650 = vmatpush.msrb.mxu3 %v1657_v10  ;;  %591 = vmatpush.msrb.mxu0 %v1330_v12  ;;  %v122_v12 = vperm.slane %v120_v8, 0 }
  0x87   :  { %611 = vmatpush.msrb.mxu1 %v1332_v13  ;;  %631 = vmatpush.msrb.mxu2 %v1338_v15 }
  0x88   :  { %651 = vmatpush.msrb.mxu3 %v1336_v14  ;;  %592 = vmatpush.msrb.mxu0 %v1342_v16  ;;  %v124_v16 = vperm.slane %v120_v8, 2 }
  0x89   :  { %612 = vmatpush.msrb.mxu1 %v1344_v33  ;;  %632 = vmatpush.msrb.mxu2 %v1350_v3 }
  0x8a   :  { %652 = vmatpush.msrb.mxu3 %v1348_v50 }
  0x9d   :  { %v173_v9 = vpop.f32.mrf.mxu0 }
  0x9e   :  { %v202_v11 = vpop.f32.mrf.mxu1 }
  0xa4   :  { %v231_v10 = vpop.f32.mrf.mxu2 }
  0xa5   :  { %v260_v6 = vpop.f32.mrf.mxu3  ;;  %v232_v57 = vadd.f32 %v231_v10, %v124_v16 }
  0xa7   :  { %v176_v13 = vpop.f32.mrf.mxu0 }
  0xa8   :  { %v205_v5 = vpop.f32.mrf.mxu1  ;;  %v1486_v15 = vadd.f32 %v176_v13, %v122_v12 }
  0xa9   :  { %v1488_v14 = vadd.f32 %v205_v5, %v123_v7 }
  0xaa   :  { %1658 = vst [vmem:[#allocation43_spill] sm:$0xff] %v1486_v15 }
  0xab   :  { %1659 = vst [vmem:[#allocation44_spill] sm:$0xff] %v1488_v14 }
  0xae   :  { %v234_v33 = vpop.f32.mrf.mxu2 }
  0xaf   :  { %v263_v1 = vpop.f32.mrf.mxu3  ;;  %v1490_v3 = vadd.f32 %v234_v33, %v124_v16 }
  0xb0   :  { %v1492_v50 = vadd.f32 %v263_v1, %v125_v4 }
  0xb1   :  { %1660 = vst [vmem:[#allocation45_spill] sm:$0xff] %v1490_v3  ;;  %v179_v2 = vpop.f32.mrf.mxu0 }
  0xb2   :  { %1661 = vst [vmem:[#allocation46_spill] sm:$0xff] %v1492_v50  ;;  %v208_v0 = vpop.f32.mrf.mxu1  ;;  %v1494_v63 = vadd.f32 %v179_v2, %v122_v12 }
  0xb3   :  { %v1496_v61 = vadd.f32 %v208_v0, %v123_v7  ;;  %v174_v0 = vadd.f32 %v173_v9, %v122_v12 }
  0xb4   :  { %1662 = vst [vmem:[#allocation47_spill] sm:$0xff] %v1494_v63 }
  0xb5   :  { %1663 = vst [vmem:[#allocation48_spill] sm:$0xff] %v1496_v61  ;;  %v203_v61 = vadd.f32 %v202_v11, %v123_v7 }
  0xb8   :  { %v237_v62 = vpop.f32.mrf.mxu2 }
  0xb9   :  { %v266_v60 = vpop.f32.mrf.mxu3  ;;  %v1498_v13 = vadd.f32 %v237_v62, %v124_v16 }
  0xba   :  { %v1500_v5 = vadd.f32 %v266_v60, %v125_v4 }
  0xbb   :  { %1664 = vst [vmem:[#allocation49_spill] sm:$0xff] %v1498_v13  ;;  %v182_v14 = vpop.f32.mrf.mxu0 }
  0xbc   :  { %1665 = vst [vmem:[#allocation50_spill] sm:$0xff] %v1500_v5  ;;  %v211_v8 = vpop.f32.mrf.mxu1  ;;  %v1502_v15 = vadd.f32 %v182_v14, %v122_v12  ;;  %v261_v14 = vadd.f32 %v260_v6, %v125_v4 }
  0xbd   :  { %v1504_v33 = vadd.f32 %v211_v8, %v123_v7 }
  0xbe   :  { %1666 = vst [vmem:[#allocation51_spill] sm:$0xff] %v1502_v15 }
  0xbf   :  { %1667 = vst [vmem:[#allocation52_spill] sm:$0xff] %v1504_v33 }
  0xc2   :  { %v240_v1 = vpop.f32.mrf.mxu2 }
  0xc3   :  { %v269_v50 = vpop.f32.mrf.mxu3  ;;  %v1506_v3 = vadd.f32 %v240_v1, %v124_v16 }
  0xc4   :  { %v1508_v2 = vadd.f32 %v269_v50, %v125_v4 }
  0xc5   :  { %v376_v63 = vpop.f32.mrf.mxu0 }
  0xc6   :  { %1668 = vst [vmem:[#allocation53_spill] sm:$0xff] %v1508_v2  ;;  %v396_v59 = vpop.f32.mrf.mxu1  ;;  %v439_v62 = vadd.f32 %v376_v63, %v174_v0 }
  0xc7   :  { %v440_v13 = vadd.f32 %v396_v59, %v203_v61 }
  0xc8   :  { %v443_v60 = vmul.f32 0.5, %v439_v62 }
  0xc9   :  { %v444_v5 = vmul.f32 0.5, %v440_v13 }
  0xca   :  { %893 = vtanh.f32 %v443_v60 }
  0xcb   :  { %895 = vtanh.f32 %v444_v5 }
  0xcc   :  { %v416_v8 = vpop.f32.mrf.mxu2 }
  0xcd   :  { %v436_v33 = vpop.f32.mrf.mxu3  ;;  %v441_v15 = vadd.f32 %v416_v8, %v232_v57 }
  0xce   :  { %v442_v58 = vadd.f32 %v436_v33, %v261_v14 }
  0xcf   :  { %v445_v1 = vmul.f32 0.5, %v441_v15 }
  0xd0   :  { %897 = vtanh.f32 %v442_v58  ;;  %v894_v50 = vpop.eup %893  ;;  %v1698_v58 = vld [vmem:[#allocation46_spill] sm:$0xff] }
  0xd1   :  { %v896_v2 = vpop.eup %895  ;;  %v449_v9 = vmul.f32 0.5, %v894_v50  ;;  %899 = vtanh.f32 %v445_v1 }
  0xd2   :  { %v450_v7 = vmul.f32 0.5, %v896_v2 }
  0xd3   :  { %v452_v11 = vadd.f32 0.5, %v449_v9 }
  0xd4   :  { %v453_v63 = vadd.f32 0.5, %v450_v7 }
  0xd6   :  { %v898_v59 = vpop.eup %897  ;;  %v456_v61 = vmul.f32 0.0, %v453_v63 }
  0xd7   :  { %v457_v12 = vmul.f32 %v898_v59, %v452_v11  ;;  %v900_v13 = vpop.eup %899 }
  0xd8   :  { %v451_v4 = vmul.f32 0.5, %v900_v13 }
  0xd9   :  { %v1510_v16 = vadd.f32 %v457_v12, %v456_v61  ;;  %v803_v12 = vld [vmem:[#allocation11 + $0x78] sm:$0xff] }
  0xda   :  { %v454_v57 = vadd.f32 0.5, %v451_v4 }
  0xdb   :  { %901 = vtanh.f32 %v1510_v16 }
  0xe1   :  { %v902_v6 = vpop.eup %901 }
  0xe2   :  { %v460_v15 = vmul.f32 %v902_v6, %v454_v57  ;;  %v1699_v57 = vld [vmem:[#allocation47_spill] sm:$0xff] }
  0xe4   :  { %484 = vmatmul.f32.vlgmr.msra.gmra.mxu0 %v460_v15  ;;  %504 = vmatmul.f32.vlgmr.msra.gmra.mxu1 %v460_v15 }
  0xe5   :  { %524 = vmatmul.f32.vlgmr.msra.gmra.mxu2 %v460_v15  ;;  %544 = vmatmul.f32.vlgmr.msra.gmra.mxu3 %v460_v15  ;;  %v1700_v15 = vld [vmem:[#allocation48_spill] sm:$0xff] }
  0xe6   :  { %686 = vmatpush.msra.mxu0 %v1150_v17  ;;  %706 = vmatpush.msra.mxu1 %v1152_v18  ;;  %v1669_v17 = vld [vmem:[#allocation18_spill] sm:$0xff]  ;;  %v1670_v18 = vld [vmem:[#allocation17_spill] sm:$0xff] }
  0xe7   :  { %726 = vmatpush.msra.mxu2 %v1158_v20  ;;  %746 = vmatpush.msra.mxu3 %v1156_v19  ;;  %v1671_v19 = vld [vmem:[#allocation19_spill] sm:$0xff]  ;;  %v1672_v20 = vld [vmem:[#allocation20_spill] sm:$0xff] }
  0xe8   :  { %687 = vmatpush.msra.mxu0 %v1162_v21  ;;  %707 = vmatpush.msra.mxu1 %v1164_v22  ;;  %v1673_v21 = vld [vmem:[#allocation22_spill] sm:$0xff]  ;;  %v1674_v22 = vld [vmem:[#allocation21_spill] sm:$0xff] }
  0xe9   :  { %727 = vmatpush.msra.mxu2 %v1170_v24  ;;  %747 = vmatpush.msra.mxu3 %v1168_v23  ;;  %v1675_v23 = vld [vmem:[#allocation23_spill] sm:$0xff]  ;;  %v1676_v24 = vld [vmem:[#allocation24_spill] sm:$0xff] }
  0xea   :  { %688 = vmatpush.msra.mxu0 %v1174_v25  ;;  %708 = vmatpush.msra.mxu1 %v1176_v26  ;;  %v1677_v25 = vld [vmem:[#allocation26_spill] sm:$0xff]  ;;  %v1678_v26 = vld [vmem:[#allocation25_spill] sm:$0xff] }
  0xeb   :  { %728 = vmatpush.msra.mxu2 %v1182_v28  ;;  %748 = vmatpush.msra.mxu3 %v1180_v27  ;;  %v1679_v27 = vld [vmem:[#allocation27_spill] sm:$0xff]  ;;  %v1680_v28 = vld [vmem:[#allocation28_spill] sm:$0xff] }
  0xec   :  { %689 = vmatpush.msra.mxu0 %v1186_v29  ;;  %709 = vmatpush.msra.mxu1 %v1188_v30  ;;  %v1681_v29 = vld [vmem:[#allocation30_spill] sm:$0xff]  ;;  %v1682_v30 = vld [vmem:[#allocation29_spill] sm:$0xff] }
  0xed   :  { %729 = vmatpush.msra.mxu2 %v1194_v32  ;;  %749 = vmatpush.msra.mxu3 %v1192_v31  ;;  %v1683_v31 = vld [vmem:[#allocation31_spill] sm:$0xff]  ;;  %v1684_v32 = vld [vmem:[#allocation32_spill] sm:$0xff] }
  0xee   :  { %690 = vmatpush.msra.mxu0 %v1202_v34  ;;  %710 = vmatpush.msra.mxu1 %v1204_v35  ;;  %v1685_v34 = vld [vmem:[#allocation34_spill] sm:$0xff]  ;;  %v1686_v35 = vld [vmem:[#allocation33_spill] sm:$0xff] }
  0xef   :  { %730 = vmatpush.msra.mxu2 %v1210_v37  ;;  %750 = vmatpush.msra.mxu3 %v1208_v36  ;;  %v1687_v36 = vld [vmem:[#allocation35_spill] sm:$0xff]  ;;  %v1688_v37 = vld [vmem:[#allocation36_spill] sm:$0xff] }
  0xf0   :  { %691 = vmatpush.msra.mxu0 %v1214_v38  ;;  %711 = vmatpush.msra.mxu1 %v1216_v39  ;;  %v1689_v38 = vld [vmem:[#allocation38_spill] sm:$0xff]  ;;  %v1690_v39 = vld [vmem:[#allocation37_spill] sm:$0xff] }
  0xf1   :  { %731 = vmatpush.msra.mxu2 %v1222_v41  ;;  %751 = vmatpush.msra.mxu3 %v1220_v40  ;;  %v1691_v40 = vld [vmem:[#allocation39_spill] sm:$0xff]  ;;  %v1692_v41 = vld [vmem:[#allocation40_spill] sm:$0xff] }
  0xf2   :  { %692 = vmatpush.msra.mxu0 %v1226_v42  ;;  %712 = vmatpush.msra.mxu1 %v1228_v43  ;;  %v1693_v42 = vld [vmem:[#allocation42_spill] sm:$0xff]  ;;  %v1694_v43 = vld [vmem:[#allocation41_spill] sm:$0xff] }
  0xf3   :  { %732 = vmatpush.msra.mxu2 %v1234_v45  ;;  %752 = vmatpush.msra.mxu3 %v1232_v44 }
  0xf4   :  { %693 = vmatpush.msra.mxu0 %v1238_v46  ;;  %713 = vmatpush.msra.mxu1 %v1240_v47  ;;  %v1695_v46 = vld [vmem:[#allocation43_spill] sm:$0xff] }
  0xf5   :  { %733 = vmatpush.msra.mxu2 %v1246_v49  ;;  %753 = vmatpush.msra.mxu3 %v1244_v48  ;;  %v1696_v48 = vld [vmem:[#allocation44_spill] sm:$0xff] }
  0xf6   :  { %694 = vmatpush.msra.mxu0 %v1254_v51  ;;  %714 = vmatpush.msra.mxu1 %v1256_v52 }
  0xf7   :  { %734 = vmatpush.msra.mxu2 %v1262_v54  ;;  %754 = vmatpush.msra.mxu3 %v1260_v53 }
  0xf8   :  { %695 = vmatpush.msra.mxu0 %v1266_v55  ;;  %715 = vmatpush.msra.mxu1 %v1268_v56  ;;  %v1697_v55 = vld [vmem:[#allocation45_spill] sm:$0xff] }
  0xf9   :  { %735 = vmatpush.msra.mxu2 %v1669_v17  ;;  %755 = vmatpush.msra.mxu3 %v1670_v18 }
  0xfa   :  { %696 = vmatpush.msra.mxu0 %v1671_v19  ;;  %716 = vmatpush.msra.mxu1 %v1672_v20 }
  0xfb   :  { %736 = vmatpush.msra.mxu2 %v1673_v21  ;;  %756 = vmatpush.msra.mxu3 %v1674_v22  ;;  %v1701_v21 = vld [vmem:[#allocation49_spill] sm:$0xff] }
  0xfc   :  { %697 = vmatpush.msra.mxu0 %v1675_v23  ;;  %717 = vmatpush.msra.mxu1 %v1676_v24  ;;  %v1702_v23 = vld [vmem:[#allocation50_spill] sm:$0xff] }
  0xfd   :  { %737 = vmatpush.msra.mxu2 %v1677_v25  ;;  %757 = vmatpush.msra.mxu3 %v1678_v26 }
  0xfe   :  { %698 = vmatpush.msra.mxu0 %v1679_v27  ;;  %718 = vmatpush.msra.mxu1 %v1680_v28 }
  0xff   :  { %738 = vmatpush.msra.mxu2 %v1681_v29  ;;  %758 = vmatpush.msra.mxu3 %v1682_v30 }
 0x100   :  { %699 = vmatpush.msra.mxu0 %v1683_v31  ;;  %719 = vmatpush.msra.mxu1 %v1684_v32 }
 0x101   :  { %739 = vmatpush.msra.mxu2 %v1685_v34  ;;  %759 = vmatpush.msra.mxu3 %v1686_v35 }
 0x102   :  { %700 = vmatpush.msra.mxu0 %v1687_v36  ;;  %720 = vmatpush.msra.mxu1 %v1688_v37 }
 0x103   :  { %740 = vmatpush.msra.mxu2 %v1689_v38  ;;  %760 = vmatpush.msra.mxu3 %v1690_v39 }
 0x104   :  { %701 = vmatpush.msra.mxu0 %v1691_v40  ;;  %721 = vmatpush.msra.mxu1 %v1692_v41 }
 0x105   :  { %741 = vmatpush.msra.mxu2 %v1693_v42  ;;  %761 = vmatpush.msra.mxu3 %v1694_v43  ;;  %v802_v42 = vld [vmem:[#allocation11 + $0x70] sm:$0xff]  ;;  %v801_v43 = vld [vmem:[#allocation11 + $0x68] sm:$0xff] }
 0x161   :  { %v485_v44 = vpop.f32.mrf.mxu0  ;;  %v505_v45 = vpop.f32.mrf.mxu1 }
 0x162   :  { %v548_v47 = vadd.f32 %v485_v44, %v1695_v46  ;;  %v549_v49 = vadd.f32 %v505_v45, %v1696_v48  ;;  %v800_v44 = vld [vmem:[#allocation11 + $0x60] sm:$0xff]  ;;  %v799_v45 = vld [vmem:[#allocation11 + $0x58] sm:$0xff]  ;;  %v798_v46 = vld [vmem:[#allocation11 + $0x50] sm:$0xff] }
 0x163   :  { %v796_v48 = vld [vmem:[#allocation11 + $0x40] sm:$0xff] }
 0x164   :  { %v552_v51 = vmul.f32 0.5, %v548_v47  ;;  %v553_v52 = vmul.f32 0.5, %v549_v49  ;;  %v797_v47 = vld [vmem:[#allocation11 + $0x48] sm:$0xff]  ;;  %v795_v49 = vld [vmem:[#allocation11 + $0x38] sm:$0xff] }
 0x166   :  { %903 = vtanh.f32 %v552_v51  ;;  %v794_v51 = vld [vmem:[#allocation11 + $0x30] sm:$0xff] }
 0x167   :  { %905 = vtanh.f32 %v553_v52  ;;  %v793_v52 = vld [vmem:[#allocation11 + $0x28] sm:$0xff] }
 0x168   :  { %v525_v53 = vpop.f32.mrf.mxu2  ;;  %v545_v54 = vpop.f32.mrf.mxu3 }
 0x169   :  { %v550_v56 = vadd.f32 %v525_v53, %v1697_v55  ;;  %v551_v10 = vadd.f32 %v545_v54, %v1698_v58  ;;  %v792_v53 = vld [vmem:[#allocation11 + $0x20] sm:$0xff]  ;;  %v791_v54 = vld [vmem:[#allocation11 + $0x18] sm:$0xff]  ;;  %v790_v55 = vld [vmem:[#allocation11 + $0x10] sm:$0xff] }
 0x16a   :  { %v788_v58 = vld [vmem:[#allocation11] sm:$0xff] }
 0x16b   :  { %v554_v5 = vmul.f32 0.5, %v550_v56  ;;  %907 = vtanh.f32 %v551_v10  ;;  %v789_v56 = vld [vmem:[#allocation11 + $0x8] sm:$0xff] }
 0x16c   :  { %v904_v33 = vpop.eup %903 }
 0x16d   :  { %v906_v2 = vpop.eup %905  ;;  %v558_v0 = vmul.f32 0.5, %v904_v33  ;;  %909 = vtanh.f32 %v554_v5  ;;  %v1703_v33 = vld [vmem:[#allocation51_spill] sm:$0xff] }
 0x16e   :  { %v559_v62 = vmul.f32 0.5, %v906_v2 }
 0x16f   :  { %v561_v60 = vadd.f32 0.5, %v558_v0  ;;  %v1704_v0 = vld [vmem:[#allocation52_spill] sm:$0xff] }
 0x170   :  { %v562_v14 = vadd.f32 0.5, %v559_v62 }
 0x171   :  { %v908_v8 = vpop.eup %907 }
 0x172   :  { %v565_v1 = vmul.f32 %v562_v14, %v1510_v16  ;;  %v566_v50 = vmul.f32 %v908_v8, %v561_v60 }
 0x173   :  { %v910_v9 = vpop.eup %909 }
 0x174   :  { %v567_v7 = vadd.f32 %v566_v50, %v565_v1  ;;  %v560_v11 = vmul.f32 0.5, %v910_v9  ;;  %v1705_v9 = vld [vmem:[#allocation53_spill] sm:$0xff] }
 0x176   :  { %911 = vtanh.f32 %v567_v7  ;;  %v563_v63 = vadd.f32 0.5, %v560_v11 }
 0x17c   :  { %v912_v59 = vpop.eup %911 }
 0x17d   :  { %v569_v61 = vmul.f32 %v912_v59, %v563_v63 }
 0x17f   :  { %593 = vmatmul.f32.vlgmr.msrb.gmra.mxu0 %v569_v61  ;;  %613 = vmatmul.f32.vlgmr.msrb.gmra.mxu1 %v569_v61 }
 0x180   :  { %633 = vmatmul.f32.vlgmr.msrb.gmra.mxu2 %v569_v61  ;;  %653 = vmatmul.f32.vlgmr.msrb.gmra.mxu3 %v569_v61 }
 0x181   :  { %808 = vmatpush.msrb.mxu0 %v803_v12 }
 0x183   :  { %809 = vmatpush.msrb.mxu0 %v802_v42 }
 0x185   :  { %810 = vmatpush.msrb.mxu0 %v801_v43 }
 0x187   :  { %811 = vmatpush.msrb.mxu0 %v800_v44 }
 0x189   :  { %812 = vmatpush.msrb.mxu0 %v799_v45 }
 0x18b   :  { %813 = vmatpush.msrb.mxu0 %v798_v46 }
 0x18d   :  { %814 = vmatpush.msrb.mxu0 %v797_v47 }
 0x18f   :  { %815 = vmatpush.msrb.mxu0 %v796_v48 }
 0x191   :  { %816 = vmatpush.msrb.mxu0 %v795_v49 }
 0x193   :  { %817 = vmatpush.msrb.mxu0 %v794_v51 }
 0x195   :  { %818 = vmatpush.msrb.mxu0 %v793_v52 }
 0x197   :  { %819 = vmatpush.msrb.mxu0 %v792_v53 }
 0x199   :  { %820 = vmatpush.msrb.mxu0 %v791_v54 }
 0x19b   :  { %821 = vmatpush.msrb.mxu0 %v790_v55 }
 0x19d   :  { %822 = vmatpush.msrb.mxu0 %v789_v56 }
 0x19f   :  { %823 = vmatpush.msrb.mxu0 %v788_v58 }
 0x1fc   :  { %v594_v13 = vpop.f32.mrf.mxu0  ;;  %v614_v4 = vpop.f32.mrf.mxu1 }
 0x1fd   :  { %v657_v6 = vadd.f32 %v594_v13, %v1699_v57  ;;  %v658_v16 = vadd.f32 %v614_v4, %v1700_v15 }
 0x1ff   :  { %v661_v17 = vmul.f32 0.5, %v657_v6  ;;  %v662_v18 = vmul.f32 0.5, %v658_v16 }
 0x201   :  { %913 = vtanh.f32 %v661_v17 }
 0x202   :  { %915 = vtanh.f32 %v662_v18 }
 0x203   :  { %v634_v19 = vpop.f32.mrf.mxu2  ;;  %v654_v20 = vpop.f32.mrf.mxu3 }
 0x204   :  { %v659_v22 = vadd.f32 %v634_v19, %v1701_v21  ;;  %v660_v24 = vadd.f32 %v654_v20, %v1702_v23  ;;  %v892_v21 = vld [vmem:[%s1601_s5] ss:$0 sm:$0xff] }
 0x206   :  { %v663_v25 = vmul.f32 0.5, %v659_v22  ;;  %917 = vtanh.f32 %v660_v24 }
 0x207   :  { %v914_v26 = vpop.eup %913 }
 0x208   :  { %v916_v27 = vpop.eup %915  ;;  %v667_v28 = vmul.f32 0.5, %v914_v26  ;;  %919 = vtanh.f32 %v663_v25 }
 0x209   :  { %v668_v29 = vmul.f32 0.5, %v916_v27 }
 0x20a   :  { %v670_v30 = vadd.f32 0.5, %v667_v28 }
 0x20b   :  { %v671_v31 = vadd.f32 0.5, %v668_v29 }
 0x20c   :  { %v918_v32 = vpop.eup %917 }
 0x20d   :  { %v674_v34 = vmul.f32 %v671_v31, %v567_v7  ;;  %v675_v35 = vmul.f32 %v918_v32, %v670_v30 }
 0x20e   :  { %v920_v36 = vpop.eup %919 }
 0x20f   :  { %v676_v37 = vadd.f32 %v675_v35, %v674_v34  ;;  %v669_v38 = vmul.f32 0.5, %v920_v36 }
 0x211   :  { %921 = vtanh.f32 %v676_v37  ;;  %v672_v39 = vadd.f32 0.5, %v669_v38 }
 0x217   :  { %v922_v40 = vpop.eup %921 }
 0x218   :  { %v678_v41 = vmul.f32 %v922_v40, %v672_v39 }
 0x21a   :  { %702 = vmatmul.f32.vlgmr.msra.gmra.mxu0 %v678_v41  ;;  %722 = vmatmul.f32.vlgmr.msra.gmra.mxu1 %v678_v41 }
 0x21b   :  { %742 = vmatmul.f32.vlgmr.msra.gmra.mxu2 %v678_v41  ;;  %762 = vmatmul.f32.vlgmr.msra.gmra.mxu3 %v678_v41 }
 0x297   :  { %v703_v10 = vpop.f32.mrf.mxu0  ;;  %v723_v5 = vpop.f32.mrf.mxu1 }
 0x298   :  { %v766_v2 = vadd.f32 %v703_v10, %v1703_v33  ;;  %v767_v62 = vadd.f32 %v723_v5, %v1704_v0 }
 0x29a   :  { %v770_v60 = vmul.f32 0.5, %v766_v2  ;;  %v771_v14 = vmul.f32 0.5, %v767_v62 }
 0x29c   :  { %923 = vtanh.f32 %v770_v60 }
 0x29d   :  { %925 = vtanh.f32 %v771_v14 }
 0x29e   :  { %v743_v8 = vpop.f32.mrf.mxu2  ;;  %v763_v1 = vpop.f32.mrf.mxu3 }
 0x29f   :  { %v768_v50 = vadd.f32 %v743_v8, %v1506_v3  ;;  %v769_v7 = vadd.f32 %v763_v1, %v1705_v9 }
 0x2a1   :  { %v772_v11 = vmul.f32 0.5, %v768_v50  ;;  %927 = vtanh.f32 %v769_v7 }
 0x2a2   :  { %v924_v63 = vpop.eup %923 }
 0x2a3   :  { %v926_v59 = vpop.eup %925  ;;  %v776_v61 = vmul.f32 0.5, %v924_v63  ;;  %929 = vtanh.f32 %v772_v11 }
 0x2a4   :  { %v777_v12 = vmul.f32 0.5, %v926_v59 }
 0x2a5   :  { %v779_v13 = vadd.f32 0.5, %v776_v61 }
 0x2a6   :  { %v780_v4 = vadd.f32 0.5, %v777_v12 }
 0x2a7   :  { %v928_v57 = vpop.eup %927 }
 0x2a8   :  { %v783_v6 = vmul.f32 %v780_v4, %v676_v37  ;;  %v784_v15 = vmul.f32 %v928_v57, %v779_v13 }
 0x2a9   :  { %v930_v16 = vpop.eup %929 }
 0x2aa   :  { %v785_v17 = vadd.f32 %v784_v15, %v783_v6  ;;  %v778_v18 = vmul.f32 0.5, %v930_v16 }
 0x2ac   :  { %931 = vtanh.f32 %v785_v17  ;;  %v781_v19 = vadd.f32 0.5, %v778_v18 }
 0x2b2   :  { %v932_v3 = vpop.eup %931 }
 0x2b3   :  { %v787_v20 = vmul.f32 %v932_v3, %v781_v19 }
 0x2b5   :  { %824 = vmatmul.f32.vlgmr.msrb.gmra.mxu0 %v787_v20 }
 0x332   :  { %v825_v22 = vpop.f32.mrf.mxu0 }
 0x333   :  { %v826_v23 = vadd.f32 %v892_v21, %v825_v22 }
 0x335   :  { %828 = vmax.xlane.f32.xlu0 %v826_v23 }
 0x3a8   :  { %v829_v24 = vpop.xlane.xlu0 %828 }
 0x3a9   :  { %v830_v25 = vsub.f32 %v826_v23, %v829_v24 }
 0x3ab   :  { %v831_v26 = vmul.f32 1.442695, %v830_v25 }
 0x3ad   :  { %933 = vpow2.f32 %v831_v26 }
 0x3b3   :  { %v934_v27 = vpop.eup %933 }
 0x3b4   :  { %833 = vadd.xlane.f32.xlu0 %v934_v27 }
 0x427   :  { %v834_v28 = vpop.xlane.xlu0 %833 }
 0x428   :  { %935 = vlog2.f32 %v834_v28 }
 0x42e   :  { %v936_v29 = vpop.eup %935 }
 0x42f   :  { %v836_v30 = vmul.f32 0.6931472, %v936_v29 }
 0x431   :  { %v837_v31 = vsub.f32 %v830_v25, %v836_v30 }
 0x433   :  { %838 = vst [vmem:[#allocation12] sm:$0xff] %v837_v31 }
 0x434   :  { %849 = dma.vmem_to_hbm [thread:$0]  %s845_s24, 128, %s847_s27, [#allocation5]  }
 0x435   :  { %1087 = dma.done.wait [#allocation5], 128  }
 0x436   :  { %1088 = vsyncadd [#allocation5], 4294967168 }
 0x437   :  { %854 = vsyncpa [#allocation4], 1 }
 0x438   :  { %855 = vsyncpa [#allocation7], 1 }
 0x439   :  { %856 = vsyncpa [#allocation10], 1 }
 0x43a   :  { %857 = vsyncpa [#allocation5], 1 }

</bundles_post_ra>
